<compile_context>
chip_gen: v7x
topology: tpu7x:2x2x1
jax: 0.10.0
libtpu: 0.0.40
codegen_flags: <defaults>
</compile_context>

<pallas_src>
import math
import functools

import jax
import jax.numpy as jnp
from jax.experimental import pallas as pl
from jax.experimental.pallas import tpu as pltpu

_LANE = 128  # TPU lane width; all feature dims are padded to a multiple of this


def _round_up(n, m):
    return ((n + m - 1) // m) * m


def _pad2d(a, rows, cols):
    return jnp.pad(a, ((0, rows - a.shape[0]), (0, cols - a.shape[1])))


# --------------------------------------------------------------------------- #
# Kernel
# --------------------------------------------------------------------------- #
def vae_kernel(
    x_ref, eps_ref,
    fw0, fb0, fw1, fb1, fw2, fb2, fw3, fb3,   # encoder trunk f (padded, bf16 W / f32 b)
    hw, hb,                                   # fused [fc_mu | fc_logvar] head
    gw0, gb0, gw1, gb1, gw2, gb2, gw3, gb3,   # decoder g
    xhat_ref, mlv_ref,
):
    cdt = fw0.dtype  # compute (MXU input) dtype, e.g. bf16

    def linear(h, w_ref, b_ref):
        # MXU matmul in cdt with f32 accumulation, f32 bias add.
        return jnp.dot(h.astype(cdt), w_ref[...],
                       preferred_element_type=jnp.float32) + b_ref[...]

    # ----- encoder f: Linear-ReLU x3, final Linear -----
    h = jnp.maximum(linear(x_ref[...], fw0, fb0), 0.0)
    h = jnp.maximum(linear(h, fw1, fb1), 0.0)
    h = jnp.maximum(linear(h, fw2, fb2), 0.0)
    h = linear(h, fw3, fb3)

    # ----- fused latent head: one matmul produces [mu | logvar] -----
    mlv = linear(h, hw, hb)                    # (TB, 2*z_pad) f32, lane-dense
    zp = mlv.shape[1] // 2
    mu = mlv[:, :zp]
    logvar = mlv[:, zp:]

    # ----- reparameterize: z = mu + eps * exp(0.5 * logvar) (f32) -----
    z = mu + eps_ref[...] * jnp.exp(0.5 * logvar)

    # ----- decoder g: Linear-ReLU x3, final Linear -----
    d = jnp.maximum(linear(z, gw0, gb0), 0.0)
    d = jnp.maximum(linear(d, gw1, gb1), 0.0)
    d = jnp.maximum(linear(d, gw2, gb2), 0.0)
    x_hat = linear(d, gw3, gb3)

    # Lane-dense, unmasked stores (last dims are multiples of 128).
    xhat_ref[...] = x_hat.astype(xhat_ref.dtype)
    mlv_ref[...] = mlv.astype(mlv_ref.dtype)


# --------------------------------------------------------------------------- #
# Wrapper
# --------------------------------------------------------------------------- #
def vae_forward(x, eps, params, *, compute_dtype=jnp.bfloat16, block_b=256):
    """Pallas VAE.forward -> (x_hat, mu, logvar).

    params: list of 10 (W, b) pairs in PyTorch order, W stored as (in, out),
            b as (1, out), all f32:
      [f0, f1, f2, f3, fc_mu, fc_logvar, g0, g1, g2, g3]
    """
    B, x_dim = x.shape
    z_dim = eps.shape[1]

    xp = _round_up(x_dim, _LANE)
    zp = _round_up(z_dim, _LANE)
    hp = _round_up(params[0][0].shape[1], _LANE)   # hidden (64 -> 128)

    # Batch tile: multiple of 8 sublanes; up to `block_b` rows per grid step.
    TB = min(block_b, _round_up(B, 8))
    Bp = _round_up(B, TB)

    def padded_wb(p, rin, cout):
        w, b = p
        return (_pad2d(w, rin, cout).astype(compute_dtype),
                _pad2d(b, 1, cout).astype(jnp.float32))

    fw0, fb0 = padded_wb(params[0], xp, hp)
    fw1, fb1 = padded_wb(params[1], hp, hp)
    fw2, fb2 = padded_wb(params[2], hp, hp)
    fw3, fb3 = padded_wb(params[3], hp, hp)

    # Fuse fc_mu / fc_logvar into one (hp, 2*zp) weight + (1, 2*zp) bias.
    muw, mub = padded_wb(params[4], hp, zp)
    lvw, lvb = padded_wb(params[5], hp, zp)
    hw = jnp.concatenate([muw, lvw], axis=1)
    hb = jnp.concatenate([mub, lvb], axis=1)

    gw0, gb0 = padded_wb(params[6], zp, hp)
    gw1, gb1 = padded_wb(params[7], hp, hp)
    gw2, gb2 = padded_wb(params[8], hp, hp)
    gw3, gb3 = padded_wb(params[9], hp, xp)

    x_p = _pad2d(x, Bp, xp).astype(compute_dtype)
    eps_p = _pad2d(eps, Bp, zp).astype(jnp.float32)   # padded eps lanes are 0

    weights = [fw0, fb0, fw1, fb1, fw2, fb2, fw3, fb3,
               hw, hb,
               gw0, gb0, gw1, gb1, gw2, gb2, gw3, gb3]

    def full_spec(a):
        # Whole array, same block every grid step -> stays VMEM-resident.
        return pl.BlockSpec(a.shape, lambda i: (0,) * a.ndim)

    in_specs = (
        [pl.BlockSpec((TB, xp), lambda i: (i, 0)),
         pl.BlockSpec((TB, zp), lambda i: (i, 0))]
        + [full_spec(w) for w in weights]
    )

    out_shape = (
        jax.ShapeDtypeStruct((Bp, xp), jnp.float32),       # x_hat (padded)
        jax.ShapeDtypeStruct((Bp, 2 * zp), jnp.float32),   # [mu | logvar] slab
    )
    out_specs = (
        pl.BlockSpec((TB, xp), lambda i: (i, 0)),
        pl.BlockSpec((TB, 2 * zp), lambda i: (i, 0)),
    )

    xhat_p, mlv_p = pl.pallas_call(
        vae_kernel,
        out_shape=out_shape,
        grid=(Bp // TB,),
        in_specs=in_specs,
        out_specs=out_specs,
        compiler_params=pltpu.CompilerParams(
            dimension_semantics=("parallel",),          # shard batch tiles across TCs
            vmem_limit_bytes=32 * 1024 * 1024,          # fits v7x's 64 MiB with headroom
        ),
    )(x_p, eps_p, *weights)

    # Strip padding in the wrapper (pure layout plumbing).
    x_hat = xhat_p[:B, :x_dim]
    mu = mlv_p[:B, :z_dim]
    logvar = mlv_p[:B, zp:zp + z_dim]
    return x_hat, mu, logvar


# --------------------------------------------------------------------------- #
# Init + reference
# --------------------------------------------------------------------------- #
def init_linear_params(key, in_dim, out_dim):
    """Mimics torch.nn.Linear default init; W stored transposed as (in, out)."""
    kw, kb = jax.random.split(key)
    bound = 1.0 / math.sqrt(in_dim)
    w = jax.random.uniform(kw, (in_dim, out_dim), jnp.float32, -bound, bound)
    b = jax.random.uniform(kb, (1, out_dim), jnp.float32, -bound, bound)
    return w, b


def init_vae_params(key, x_dim, z_dim, hidden=64):
    dims = [
        (x_dim, hidden), (hidden, hidden), (hidden, hidden), (hidden, hidden),  # f
        (hidden, z_dim),                                                        # fc_mu
        (hidden, z_dim),                                                        # fc_logvar
        (z_dim, hidden), (hidden, hidden), (hidden, hidden), (hidden, x_dim),   # g
    ]
    keys = jax.random.split(key, len(dims))
    return [init_linear_params(k, i, o) for k, (i, o) in zip(keys, dims)]


def vae_forward_ref(x, eps, params, compute_dtype=jnp.float32):
    """Pure-JAX reference. With compute_dtype=bf16 it mirrors the kernel's
    bf16-matmul / f32-accumulate numerics; with f32 it is the exact PyTorch
    forward semantics."""
    def lin(h, p):
        w, b = p
        return jnp.dot(h.astype(compute_dtype), w.astype(compute_dtype),
                       preferred_element_type=jnp.float32) + b

    h = x
    for i in range(3):
        h = jax.nn.relu(lin(h, params[i]))
    h = lin(h, params[3])
    mu = lin(h, params[4])
    logvar = lin(h, params[5])
    z = mu + eps * jnp.exp(0.5 * logvar)
    d = z
    for i in range(6, 9):
        d = jax.nn.relu(lin(d, params[i]))
    x_hat = lin(d, params[9])
    return x_hat, mu, logvar


# --------------------------------------------------------------------------- #
if __name__ == "__main__":
    B, X_DIM, Z_DIM = 8, 16, 8

    key = jax.random.PRNGKey(0)
    k_params, k_x, k_eps = jax.random.split(key, 3)

    params = init_vae_params(k_params, X_DIM, Z_DIM)
    x = jax.random.normal(k_x, (B, X_DIM), jnp.float32)
    # eps corresponds to torch.randn_like(std); generated here and passed in.
    eps = jax.random.normal(k_eps, (B, Z_DIM), jnp.float32)

    fwd = jax.jit(functools.partial(vae_forward, compute_dtype=jnp.bfloat16))
    x_hat, mu, logvar = fwd(x, eps, params)
    jax.block_until_ready((x_hat, mu, logvar))

    # 1) Tight check vs a reference using identical bf16-input / f32-accum numerics.
    xr, mr, lr = vae_forward_ref(x, eps, params, compute_dtype=jnp.bfloat16)
    assert jnp.allclose(x_hat, xr, atol=1e-4, rtol=1e-4)
    assert jnp.allclose(mu, mr, atol=1e-4, rtol=1e-4)
    assert jnp.allclose(logvar, lr, atol=1e-4, rtol=1e-4)

    # 2) Loose sanity check vs full-f32 PyTorch-equivalent semantics
    #    (tolerance loosened for the bf16 MXU path, per review).
    xr32, mr32, lr32 = vae_forward_ref(x, eps, params, compute_dtype=jnp.float32)
    assert jnp.allclose(x_hat, xr32, atol=1e-1, rtol=1e-1)
    assert jnp.allclose(mu, mr32, atol=1e-1, rtol=1e-1)
    assert jnp.allclose(logvar, lr32, atol=1e-1, rtol=1e-1)

    print("KERNEL_OK")
</pallas_src>

<mosaic_0001>
module attributes {stable_mosaic.version = 11 : i64} {
  func.func @vae_kernel(%arg0: i32, %arg1: memref<8x128xbf16, #tpu.memory_space<vmem>>, %arg2: memref<8x128xf32, #tpu.memory_space<vmem>>, %arg3: memref<128x128xbf16, #tpu.memory_space<vmem>>, %arg4: memref<1x128xf32, #tpu.memory_space<vmem>>, %arg5: memref<128x128xbf16, #tpu.memory_space<vmem>>, %arg6: memref<1x128xf32, #tpu.memory_space<vmem>>, %arg7: memref<128x128xbf16, #tpu.memory_space<vmem>>, %arg8: memref<1x128xf32, #tpu.memory_space<vmem>>, %arg9: memref<128x128xbf16, #tpu.memory_space<vmem>>, %arg10: memref<1x128xf32, #tpu.memory_space<vmem>>, %arg11: memref<128x256xbf16, #tpu.memory_space<vmem>>, %arg12: memref<1x256xf32, #tpu.memory_space<vmem>>, %arg13: memref<128x128xbf16, #tpu.memory_space<vmem>>, %arg14: memref<1x128xf32, #tpu.memory_space<vmem>>, %arg15: memref<128x128xbf16, #tpu.memory_space<vmem>>, %arg16: memref<1x128xf32, #tpu.memory_space<vmem>>, %arg17: memref<128x128xbf16, #tpu.memory_space<vmem>>, %arg18: memref<1x128xf32, #tpu.memory_space<vmem>>, %arg19: memref<128x128xbf16, #tpu.memory_space<vmem>>, %arg20: memref<1x128xf32, #tpu.memory_space<vmem>>, %arg21: memref<8x128xf32, #tpu.memory_space<vmem>>, %arg22: memref<8x256xf32, #tpu.memory_space<vmem>>) attributes {dimension_semantics = [#tpu.dimension_semantics<parallel>], iteration_bounds = array<i64: 1>, scalar_prefetch = 0 : i64, scratch_operands = 0 : i64, tpu.core_type = #tpu.core_type<tc>, window_params = [{transform_indices = @transform_0, window_bounds = array<i64: 8, 128>}, {transform_indices = @transform_1, window_bounds = array<i64: 8, 128>}, {pipeline_mode = #tpu.pipeline_mode<synchronous>, transform_indices = @transform_2, window_bounds = array<i64: 128, 128>}, {pipeline_mode = #tpu.pipeline_mode<synchronous>, transform_indices = @transform_3, window_bounds = array<i64: 1, 128>}, {pipeline_mode = #tpu.pipeline_mode<synchronous>, transform_indices = @transform_4, window_bounds = array<i64: 128, 128>}, {pipeline_mode = #tpu.pipeline_mode<synchronous>, transform_indices = @transform_5, window_bounds = array<i64: 1, 128>}, {pipeline_mode = #tpu.pipeline_mode<synchronous>, transform_indices = @transform_6, window_bounds = array<i64: 128, 128>}, {pipeline_mode = #tpu.pipeline_mode<synchronous>, transform_indices = @transform_7, window_bounds = array<i64: 1, 128>}, {pipeline_mode = #tpu.pipeline_mode<synchronous>, transform_indices = @transform_8, window_bounds = array<i64: 128, 128>}, {pipeline_mode = #tpu.pipeline_mode<synchronous>, transform_indices = @transform_9, window_bounds = array<i64: 1, 128>}, {pipeline_mode = #tpu.pipeline_mode<synchronous>, transform_indices = @transform_10, window_bounds = array<i64: 128, 256>}, {pipeline_mode = #tpu.pipeline_mode<synchronous>, transform_indices = @transform_11, window_bounds = array<i64: 1, 256>}, {pipeline_mode = #tpu.pipeline_mode<synchronous>, transform_indices = @transform_12, window_bounds = array<i64: 128, 128>}, {pipeline_mode = #tpu.pipeline_mode<synchronous>, transform_indices = @transform_13, window_bounds = array<i64: 1, 128>}, {pipeline_mode = #tpu.pipeline_mode<synchronous>, transform_indices = @transform_14, window_bounds = array<i64: 128, 128>}, {pipeline_mode = #tpu.pipeline_mode<synchronous>, transform_indices = @transform_15, window_bounds = array<i64: 1, 128>}, {pipeline_mode = #tpu.pipeline_mode<synchronous>, transform_indices = @transform_16, window_bounds = array<i64: 128, 128>}, {pipeline_mode = #tpu.pipeline_mode<synchronous>, transform_indices = @transform_17, window_bounds = array<i64: 1, 128>}, {pipeline_mode = #tpu.pipeline_mode<synchronous>, transform_indices = @transform_18, window_bounds = array<i64: 128, 128>}, {pipeline_mode = #tpu.pipeline_mode<synchronous>, transform_indices = @transform_19, window_bounds = array<i64: 1, 128>}, {transform_indices = @transform_20, window_bounds = array<i64: 8, 128>}, {transform_indices = @transform_21, window_bounds = array<i64: 8, 256>}]} {
    %c0 = arith.constant 0 : index
    %c0_0 = arith.constant 0 : index
    %0 = vector.load %arg1[%c0, %c0_0] : memref<8x128xbf16, #tpu.memory_space<vmem>>, vector<8x128xbf16>
    %c0_1 = arith.constant 0 : index
    %c0_2 = arith.constant 0 : index
    %1 = vector.load %arg3[%c0_1, %c0_2] : memref<128x128xbf16, #tpu.memory_space<vmem>>, vector<128x128xbf16>
    %cst = arith.constant dense<0.000000e+00> : vector<8x128xf32>
    %2 = tpu.matmul %0, %1, %cst {dimension_numbers = #tpu.dot_dimension_numbers<[1], [0], [0], [1], [0, 0, 1, 1], [], []>} : vector<8x128xbf16>, vector<128x128xbf16>, vector<8x128xf32> -> vector<8x128xf32>
    %c0_3 = arith.constant 0 : index
    %c0_4 = arith.constant 0 : index
    %3 = vector.load %arg4[%c0_3, %c0_4] : memref<1x128xf32, #tpu.memory_space<vmem>>, vector<1x128xf32>
    %4 = vector.broadcast %3 : vector<1x128xf32> to vector<8x128xf32>
    %5 = arith.addf %2, %4 : vector<8x128xf32>
    %cst_5 = arith.constant 0.000000e+00 : f32
    %6 = vector.broadcast %cst_5 : f32 to vector<8x128xf32>
    %7 = arith.maximumf %5, %6 : vector<8x128xf32>
    %8 = arith.truncf %7 : vector<8x128xf32> to vector<8x128xbf16>
    %c0_6 = arith.constant 0 : index
    %c0_7 = arith.constant 0 : index
    %9 = vector.load %arg5[%c0_6, %c0_7] : memref<128x128xbf16, #tpu.memory_space<vmem>>, vector<128x128xbf16>
    %cst_8 = arith.constant dense<0.000000e+00> : vector<8x128xf32>
    %10 = tpu.matmul %8, %9, %cst_8 {dimension_numbers = #tpu.dot_dimension_numbers<[1], [0], [0], [1], [0, 0, 1, 1], [], []>} : vector<8x128xbf16>, vector<128x128xbf16>, vector<8x128xf32> -> vector<8x128xf32>
    %c0_9 = arith.constant 0 : index
    %c0_10 = arith.constant 0 : index
    %11 = vector.load %arg6[%c0_9, %c0_10] : memref<1x128xf32, #tpu.memory_space<vmem>>, vector<1x128xf32>
    %12 = vector.broadcast %11 : vector<1x128xf32> to vector<8x128xf32>
    %13 = arith.addf %10, %12 : vector<8x128xf32>
    %cst_11 = arith.constant 0.000000e+00 : f32
    %14 = vector.broadcast %cst_11 : f32 to vector<8x128xf32>
    %15 = arith.maximumf %13, %14 : vector<8x128xf32>
    %16 = arith.truncf %15 : vector<8x128xf32> to vector<8x128xbf16>
    %c0_12 = arith.constant 0 : index
    %c0_13 = arith.constant 0 : index
    %17 = vector.load %arg7[%c0_12, %c0_13] : memref<128x128xbf16, #tpu.memory_space<vmem>>, vector<128x128xbf16>
    %cst_14 = arith.constant dense<0.000000e+00> : vector<8x128xf32>
    %18 = tpu.matmul %16, %17, %cst_14 {dimension_numbers = #tpu.dot_dimension_numbers<[1], [0], [0], [1], [0, 0, 1, 1], [], []>} : vector<8x128xbf16>, vector<128x128xbf16>, vector<8x128xf32> -> vector<8x128xf32>
    %c0_15 = arith.constant 0 : index
    %c0_16 = arith.constant 0 : index
    %19 = vector.load %arg8[%c0_15, %c0_16] : memref<1x128xf32, #tpu.memory_space<vmem>>, vector<1x128xf32>
    %20 = vector.broadcast %19 : vector<1x128xf32> to vector<8x128xf32>
    %21 = arith.addf %18, %20 : vector<8x128xf32>
    %cst_17 = arith.constant 0.000000e+00 : f32
    %22 = vector.broadcast %cst_17 : f32 to vector<8x128xf32>
    %23 = arith.maximumf %21, %22 : vector<8x128xf32>
    %24 = arith.truncf %23 : vector<8x128xf32> to vector<8x128xbf16>
    %c0_18 = arith.constant 0 : index
    %c0_19 = arith.constant 0 : index
    %25 = vector.load %arg9[%c0_18, %c0_19] : memref<128x128xbf16, #tpu.memory_space<vmem>>, vector<128x128xbf16>
    %cst_20 = arith.constant dense<0.000000e+00> : vector<8x128xf32>
    %26 = tpu.matmul %24, %25, %cst_20 {dimension_numbers = #tpu.dot_dimension_numbers<[1], [0], [0], [1], [0, 0, 1, 1], [], []>} : vector<8x128xbf16>, vector<128x128xbf16>, vector<8x128xf32> -> vector<8x128xf32>
    %c0_21 = arith.constant 0 : index
    %c0_22 = arith.constant 0 : index
    %27 = vector.load %arg10[%c0_21, %c0_22] : memref<1x128xf32, #tpu.memory_space<vmem>>, vector<1x128xf32>
    %28 = vector.broadcast %27 : vector<1x128xf32> to vector<8x128xf32>
    %29 = arith.addf %26, %28 : vector<8x128xf32>
    %30 = arith.truncf %29 : vector<8x128xf32> to vector<8x128xbf16>
    %c0_23 = arith.constant 0 : index
    %c0_24 = arith.constant 0 : index
    %31 = vector.load %arg11[%c0_23, %c0_24] : memref<128x256xbf16, #tpu.memory_space<vmem>>, vector<128x256xbf16>
    %cst_25 = arith.constant dense<0.000000e+00> : vector<8x256xf32>
    %32 = tpu.matmul %30, %31, %cst_25 {dimension_numbers = #tpu.dot_dimension_numbers<[1], [0], [0], [1], [0, 0, 1, 1], [], []>} : vector<8x128xbf16>, vector<128x256xbf16>, vector<8x256xf32> -> vector<8x256xf32>
    %c0_26 = arith.constant 0 : index
    %c0_27 = arith.constant 0 : index
    %33 = vector.load %arg12[%c0_26, %c0_27] : memref<1x256xf32, #tpu.memory_space<vmem>>, vector<1x256xf32>
    %34 = vector.broadcast %33 : vector<1x256xf32> to vector<8x256xf32>
    %35 = arith.addf %32, %34 : vector<8x256xf32>
    %36 = vector.extract_strided_slice %35 {offsets = [0, 0], sizes = [8, 128], strides = [1, 1]} : vector<8x256xf32> to vector<8x128xf32>
    %37 = vector.extract_strided_slice %35 {offsets = [0, 128], sizes = [8, 128], strides = [1, 1]} : vector<8x256xf32> to vector<8x128xf32>
    %c0_28 = arith.constant 0 : index
    %c0_29 = arith.constant 0 : index
    %38 = vector.load %arg2[%c0_28, %c0_29] : memref<8x128xf32, #tpu.memory_space<vmem>>, vector<8x128xf32>
    %cst_30 = arith.constant 5.000000e-01 : f32
    %39 = vector.broadcast %cst_30 : f32 to vector<8x128xf32>
    %40 = arith.mulf %39, %37 : vector<8x128xf32>
    %41 = math.exp %40 : vector<8x128xf32>
    %42 = arith.mulf %38, %41 : vector<8x128xf32>
    %43 = arith.addf %36, %42 : vector<8x128xf32>
    %44 = arith.truncf %43 : vector<8x128xf32> to vector<8x128xbf16>
    %c0_31 = arith.constant 0 : index
    %c0_32 = arith.constant 0 : index
    %45 = vector.load %arg13[%c0_31, %c0_32] : memref<128x128xbf16, #tpu.memory_space<vmem>>, vector<128x128xbf16>
    %cst_33 = arith.constant dense<0.000000e+00> : vector<8x128xf32>
    %46 = tpu.matmul %44, %45, %cst_33 {dimension_numbers = #tpu.dot_dimension_numbers<[1], [0], [0], [1], [0, 0, 1, 1], [], []>} : vector<8x128xbf16>, vector<128x128xbf16>, vector<8x128xf32> -> vector<8x128xf32>
    %c0_34 = arith.constant 0 : index
    %c0_35 = arith.constant 0 : index
    %47 = vector.load %arg14[%c0_34, %c0_35] : memref<1x128xf32, #tpu.memory_space<vmem>>, vector<1x128xf32>
    %48 = vector.broadcast %47 : vector<1x128xf32> to vector<8x128xf32>
    %49 = arith.addf %46, %48 : vector<8x128xf32>
    %cst_36 = arith.constant 0.000000e+00 : f32
    %50 = vector.broadcast %cst_36 : f32 to vector<8x128xf32>
    %51 = arith.maximumf %49, %50 : vector<8x128xf32>
    %52 = arith.truncf %51 : vector<8x128xf32> to vector<8x128xbf16>
    %c0_37 = arith.constant 0 : index
    %c0_38 = arith.constant 0 : index
    %53 = vector.load %arg15[%c0_37, %c0_38] : memref<128x128xbf16, #tpu.memory_space<vmem>>, vector<128x128xbf16>
    %cst_39 = arith.constant dense<0.000000e+00> : vector<8x128xf32>
    %54 = tpu.matmul %52, %53, %cst_39 {dimension_numbers = #tpu.dot_dimension_numbers<[1], [0], [0], [1], [0, 0, 1, 1], [], []>} : vector<8x128xbf16>, vector<128x128xbf16>, vector<8x128xf32> -> vector<8x128xf32>
    %c0_40 = arith.constant 0 : index
    %c0_41 = arith.constant 0 : index
    %55 = vector.load %arg16[%c0_40, %c0_41] : memref<1x128xf32, #tpu.memory_space<vmem>>, vector<1x128xf32>
    %56 = vector.broadcast %55 : vector<1x128xf32> to vector<8x128xf32>
    %57 = arith.addf %54, %56 : vector<8x128xf32>
    %cst_42 = arith.constant 0.000000e+00 : f32
    %58 = vector.broadcast %cst_42 : f32 to vector<8x128xf32>
    %59 = arith.maximumf %57, %58 : vector<8x128xf32>
    %60 = arith.truncf %59 : vector<8x128xf32> to vector<8x128xbf16>
    %c0_43 = arith.constant 0 : index
    %c0_44 = arith.constant 0 : index
    %61 = vector.load %arg17[%c0_43, %c0_44] : memref<128x128xbf16, #tpu.memory_space<vmem>>, vector<128x128xbf16>
    %cst_45 = arith.constant dense<0.000000e+00> : vector<8x128xf32>
    %62 = tpu.matmul %60, %61, %cst_45 {dimension_numbers = #tpu.dot_dimension_numbers<[1], [0], [0], [1], [0, 0, 1, 1], [], []>} : vector<8x128xbf16>, vector<128x128xbf16>, vector<8x128xf32> -> vector<8x128xf32>
    %c0_46 = arith.constant 0 : index
    %c0_47 = arith.constant 0 : index
    %63 = vector.load %arg18[%c0_46, %c0_47] : memref<1x128xf32, #tpu.memory_space<vmem>>, vector<1x128xf32>
    %64 = vector.broadcast %63 : vector<1x128xf32> to vector<8x128xf32>
    %65 = arith.addf %62, %64 : vector<8x128xf32>
    %cst_48 = arith.constant 0.000000e+00 : f32
    %66 = vector.broadcast %cst_48 : f32 to vector<8x128xf32>
    %67 = arith.maximumf %65, %66 : vector<8x128xf32>
    %68 = arith.truncf %67 : vector<8x128xf32> to vector<8x128xbf16>
    %c0_49 = arith.constant 0 : index
    %c0_50 = arith.constant 0 : index
    %69 = vector.load %arg19[%c0_49, %c0_50] : memref<128x128xbf16, #tpu.memory_space<vmem>>, vector<128x128xbf16>
    %cst_51 = arith.constant dense<0.000000e+00> : vector<8x128xf32>
    %70 = tpu.matmul %68, %69, %cst_51 {dimension_numbers = #tpu.dot_dimension_numbers<[1], [0], [0], [1], [0, 0, 1, 1], [], []>} : vector<8x128xbf16>, vector<128x128xbf16>, vector<8x128xf32> -> vector<8x128xf32>
    %c0_52 = arith.constant 0 : index
    %c0_53 = arith.constant 0 : index
    %71 = vector.load %arg20[%c0_52, %c0_53] : memref<1x128xf32, #tpu.memory_space<vmem>>, vector<1x128xf32>
    %72 = vector.broadcast %71 : vector<1x128xf32> to vector<8x128xf32>
    %73 = arith.addf %70, %72 : vector<8x128xf32>
    %c0_54 = arith.constant 0 : index
    %c0_55 = arith.constant 0 : index
    %74 = vector.load %arg21[%c0_54, %c0_55] : memref<8x128xf32, #tpu.memory_space<vmem>>, vector<8x128xf32>
    tpu.vector_store %arg21[%c0_54, %c0_55], %73 {strides = array<i32>} : memref<8x128xf32, #tpu.memory_space<vmem>>, vector<8x128xf32>,
    %c0_56 = arith.constant 0 : index
    %c0_57 = arith.constant 0 : index
    %75 = vector.load %arg22[%c0_56, %c0_57] : memref<8x256xf32, #tpu.memory_space<vmem>>, vector<8x256xf32>
    tpu.vector_store %arg22[%c0_56, %c0_57], %35 {strides = array<i32>} : memref<8x256xf32, #tpu.memory_space<vmem>>, vector<8x256xf32>,
    return
  }
  func.func @transform_0(%arg0: i32) -> (i32, i32) {
    %c0_i32 = arith.constant 0 : i32
    %c0_i32_0 = arith.constant 0 : i32
    return %arg0, %c0_i32 : i32, i32
  }
  func.func @transform_1(%arg0: i32) -> (i32, i32) {
    %c0_i32 = arith.constant 0 : i32
    %c0_i32_0 = arith.constant 0 : i32
    return %arg0, %c0_i32 : i32, i32
  }
  func.func @transform_2(%arg0: i32) -> (i32, i32) {
    %c0_i32 = arith.constant 0 : i32
    %c0_i32_0 = arith.constant 0 : i32
    %c0_i32_1 = arith.constant 0 : i32
    return %c0_i32, %c0_i32_0 : i32, i32
  }
  func.func @transform_3(%arg0: i32) -> (i32, i32) {
    %c0_i32 = arith.constant 0 : i32
    %c0_i32_0 = arith.constant 0 : i32
    %c0_i32_1 = arith.constant 0 : i32
    return %c0_i32, %c0_i32_0 : i32, i32
  }
  func.func @transform_4(%arg0: i32) -> (i32, i32) {
    %c0_i32 = arith.constant 0 : i32
    %c0_i32_0 = arith.constant 0 : i32
    %c0_i32_1 = arith.constant 0 : i32
    return %c0_i32, %c0_i32_0 : i32, i32
  }
  func.func @transform_5(%arg0: i32) -> (i32, i32) {
    %c0_i32 = arith.constant 0 : i32
    %c0_i32_0 = arith.constant 0 : i32
    %c0_i32_1 = arith.constant 0 : i32
    return %c0_i32, %c0_i32_0 : i32, i32
  }
  func.func @transform_6(%arg0: i32) -> (i32, i32) {
    %c0_i32 = arith.constant 0 : i32
    %c0_i32_0 = arith.constant 0 : i32
    %c0_i32_1 = arith.constant 0 : i32
    return %c0_i32, %c0_i32_0 : i32, i32
  }
  func.func @transform_7(%arg0: i32) -> (i32, i32) {
    %c0_i32 = arith.constant 0 : i32
    %c0_i32_0 = arith.constant 0 : i32
    %c0_i32_1 = arith.constant 0 : i32
    return %c0_i32, %c0_i32_0 : i32, i32
  }
  func.func @transform_8(%arg0: i32) -> (i32, i32) {
    %c0_i32 = arith.constant 0 : i32
    %c0_i32_0 = arith.constant 0 : i32
    %c0_i32_1 = arith.constant 0 : i32
    return %c0_i32, %c0_i32_0 : i32, i32
  }
  func.func @transform_9(%arg0: i32) -> (i32, i32) {
    %c0_i32 = arith.constant 0 : i32
    %c0_i32_0 = arith.constant 0 : i32
    %c0_i32_1 = arith.constant 0 : i32
    return %c0_i32, %c0_i32_0 : i32, i32
  }
  func.func @transform_10(%arg0: i32) -> (i32, i32) {
    %c0_i32 = arith.constant 0 : i32
    %c0_i32_0 = arith.constant 0 : i32
    %c0_i32_1 = arith.constant 0 : i32
    return %c0_i32, %c0_i32_0 : i32, i32
  }
  func.func @transform_11(%arg0: i32) -> (i32, i32) {
    %c0_i32 = arith.constant 0 : i32
    %c0_i32_0 = arith.constant 0 : i32
    %c0_i32_1 = arith.constant 0 : i32
    return %c0_i32, %c0_i32_0 : i32, i32
  }
  func.func @transform_12(%arg0: i32) -> (i32, i32) {
    %c0_i32 = arith.constant 0 : i32
    %c0_i32_0 = arith.constant 0 : i32
    %c0_i32_1 = arith.constant 0 : i32
    return %c0_i32, %c0_i32_0 : i32, i32
  }
  func.func @transform_13(%arg0: i32) -> (i32, i32) {
    %c0_i32 = arith.constant 0 : i32
    %c0_i32_0 = arith.constant 0 : i32
    %c0_i32_1 = arith.constant 0 : i32
    return %c0_i32, %c0_i32_0 : i32, i32
  }
  func.func @transform_14(%arg0: i32) -> (i32, i32) {
    %c0_i32 = arith.constant 0 : i32
    %c0_i32_0 = arith.constant 0 : i32
    %c0_i32_1 = arith.constant 0 : i32
    return %c0_i32, %c0_i32_0 : i32, i32
  }
  func.func @transform_15(%arg0: i32) -> (i32, i32) {
    %c0_i32 = arith.constant 0 : i32
    %c0_i32_0 = arith.constant 0 : i32
    %c0_i32_1 = arith.constant 0 : i32
    return %c0_i32, %c0_i32_0 : i32, i32
  }
  func.func @transform_16(%arg0: i32) -> (i32, i32) {
    %c0_i32 = arith.constant 0 : i32
    %c0_i32_0 = arith.constant 0 : i32
    %c0_i32_1 = arith.constant 0 : i32
    return %c0_i32, %c0_i32_0 : i32, i32
  }
  func.func @transform_17(%arg0: i32) -> (i32, i32) {
    %c0_i32 = arith.constant 0 : i32
    %c0_i32_0 = arith.constant 0 : i32
    %c0_i32_1 = arith.constant 0 : i32
    return %c0_i32, %c0_i32_0 : i32, i32
  }
  func.func @transform_18(%arg0: i32) -> (i32, i32) {
    %c0_i32 = arith.constant 0 : i32
    %c0_i32_0 = arith.constant 0 : i32
    %c0_i32_1 = arith.constant 0 : i32
    return %c0_i32, %c0_i32_0 : i32, i32
  }
  func.func @transform_19(%arg0: i32) -> (i32, i32) {
    %c0_i32 = arith.constant 0 : i32
    %c0_i32_0 = arith.constant 0 : i32
    %c0_i32_1 = arith.constant 0 : i32
    return %c0_i32, %c0_i32_0 : i32, i32
  }
  func.func @transform_20(%arg0: i32) -> (i32, i32) {
    %c0_i32 = arith.constant 0 : i32
    %c0_i32_0 = arith.constant 0 : i32
    return %arg0, %c0_i32 : i32, i32
  }
  func.func @transform_21(%arg0: i32) -> (i32, i32) {
    %c0_i32 = arith.constant 0 : i32
    %c0_i32_0 = arith.constant 0 : i32
    return %arg0, %c0_i32 : i32, i32
  }
}

</mosaic_0001>

<bundles_post_ra>
// kernel: vae_forward.1
= control target key start
LH: loop header
LB: loop body
LE: loop exit
PB: predicated region body
PF: predicated region fallthrough
CT: control target
= control target key end

     0   :  { %s2071_s0 = inlined_call_operand.vmem [shape: bf16[8,128], index: 0, kind: input, shape index: {}]   ;;  %s2072_s1 = inlined_call_operand.vmem [shape: f32[8,128], index: 1, kind: input, shape index: {}]   ;;  %s2073_s2 = inlined_call_operand.vmem [shape: bf16[128,128], index: 2, kind: input, shape index: {}]   ;;  %s2074_s3 = inlined_call_operand.vmem [shape: f32[1,128], index: 3, kind: input, shape index: {}]   ;;  %s2075_s4 = inlined_call_operand.vmem [shape: bf16[128,128], index: 4, kind: input, shape index: {}]   ;;  %s2076_s5 = inlined_call_operand.vmem [shape: f32[1,128], index: 5, kind: input, shape index: {}]   ;;  %s2077_s6 = inlined_call_operand.vmem [shape: bf16[128,128], index: 6, kind: input, shape index: {}]   ;;  %s2078_s7 = inlined_call_operand.vmem [shape: f32[1,128], index: 7, kind: input, shape index: {}]   ;;  %s2079_s8 = inlined_call_operand.vmem [shape: bf16[128,128], index: 8, kind: input, shape index: {}]   ;;  %s2080_s9 = inlined_call_operand.vmem [shape: f32[1,128], index: 9, kind: input, shape index: {}]   ;;  %s2081_s10 = inlined_call_operand.vmem [shape: bf16[128,256], index: 10, kind: input, shape index: {}]   ;;  %s2082_s11 = inlined_call_operand.vmem [shape: f32[1,256], index: 11, kind: input, shape index: {}]   ;;  %s2083_s12 = inlined_call_operand.vmem [shape: bf16[128,128], index: 12, kind: input, shape index: {}]   ;;  %s2084_s13 = inlined_call_operand.vmem [shape: f32[1,128], index: 13, kind: input, shape index: {}]   ;;  %s2085_s14 = inlined_call_operand.vmem [shape: bf16[128,128], index: 14, kind: input, shape index: {}]   ;;  %s2086_s15 = inlined_call_operand.vmem [shape: f32[1,128], index: 15, kind: input, shape index: {}]   ;;  %s2087_s16 = inlined_call_operand.vmem [shape: bf16[128,128], index: 16, kind: input, shape index: {}]   ;;  %s2088_s17 = inlined_call_operand.vmem [shape: f32[1,128], index: 17, kind: input, shape index: {}]   ;;  %s2089_s18 = inlined_call_operand.vmem [shape: bf16[128,128], index: 18, kind: input, shape index: {}]   ;;  %s2090_s19 = inlined_call_operand.vmem [shape: f32[1,128], index: 19, kind: input, shape index: {}]   ;;  %s2091_s20 = inlined_call_operand.hbm [shape: f32[8,128], index: 20, kind: output, shape index: {0}]   ;;  %s2092_s21 = inlined_call_operand.vmem [shape: f32[8,256], index: 21, kind: output, shape index: {1}]  }
   0x1   :  { %2095 = sst [smem:[#allocation5_spill]] %s2071_s0 }
   0x2   :  { %2096 = sst [smem:[#allocation6_spill]] %s2072_s1 }
   0x3   :  { %2097 = sst [smem:[#allocation7_spill]] %s2073_s2 }
   0x4   :  { %2098 = sst [smem:[#allocation8_spill]] %s2074_s3 }
   0x5   :  { %2099 = sst [smem:[#allocation9_spill]] %s2075_s4 }
   0x6   :  { %2100 = sst [smem:[#allocation10_spill]] %s2076_s5 }
   0x7   :  { %s2101_s26 = sld [smem:[#allocation7_spill]]  ;;  %v1586_v1 = vmov 0.0   ;;  %vm1587_vm0 = vmmov 0   ;;  %s2102_s30 = sld [smem:[#allocation9_spill]] }
   0x8   :  { %1308 = vmatprep.subr.bf16.mxu0 %v1586_v1  ;;  %1328 = vmatprep.subr.bf16.mxu1 %v1586_v1  ;;  %s2103_s28 = sld [smem:[#allocation5_spill]] }
   0x9   :  { %1324 = vmatprep.mubr.msk.bf16.mxu0 %vm1587_vm0, %v1586_v1  ;;  %1344 = vmatprep.mubr.msk.bf16.mxu1 %vm1587_vm0, %v1586_v1 }
   0xd   :  { %v1472_v0 = vld [vmem:[%s2101_s26] sm:$0xff]   ;;  %v1473_v2 = vld [vmem:[%s2101_s26 + $0x8] sm:$0xff]   ;;  %v1474_v3 = vld [vmem:[%s2101_s26 + $0x10] sm:$0xff]  }
   0xe   :  { %1309 = vmatpush3.bf16.msra.mxu0 %v1472_v0  ;;  %v1480_v4 = vld [vmem:[%s2102_s30] sm:$0xff]   ;;  %v1475_v5 = vld [vmem:[%s2101_s26 + $0x18] sm:$0xff]   ;;  %v1481_v6 = vld [vmem:[%s2102_s30 + $0x8] sm:$0xff]  }
   0xf   :  { %1310 = vmatprep.subr.bf16.mxu0 %v1586_v1  ;;  %1329 = vmatpush3.bf16.msra.mxu1 %v1480_v4  ;;  %v1476_v7 = vld [vmem:[%s2101_s26 + $0x20] sm:$0xff]   ;;  %v1482_v8 = vld [vmem:[%s2102_s30 + $0x10] sm:$0xff]   ;;  %v1477_v9 = vld [vmem:[%s2101_s26 + $0x28] sm:$0xff]  }
  0x10   :  { %1330 = vmatprep.subr.bf16.mxu1 %v1586_v1  ;;  %v1483_v10 = vld [vmem:[%s2102_s30 + $0x18] sm:$0xff]   ;;  %v1478_v11 = vld [vmem:[%s2101_s26 + $0x30] sm:$0xff]   ;;  %v1484_v12 = vld [vmem:[%s2102_s30 + $0x20] sm:$0xff]  }
  0x11   :  { %v1479_v13 = vld [vmem:[%s2101_s26 + $0x38] sm:$0xff]   ;;  %v1485_v14 = vld [vmem:[%s2102_s30 + $0x28] sm:$0xff]   ;;  %v69_v15 = vld [vmem:[%s2103_s28] sm:$0xf] }
  0x12   :  { %1311 = vmatpush3.bf16.msra.mxu0 %v1473_v2 }
  0x13   :  { %1312 = vmatprep.subr.bf16.mxu0 %v1586_v1  ;;  %1331 = vmatpush3.bf16.msra.mxu1 %v1481_v6 }
  0x14   :  { %1332 = vmatprep.subr.bf16.mxu1 %v1586_v1 }
  0x16   :  { %1313 = vmatpush3.bf16.msra.mxu0 %v1474_v3 }
  0x17   :  { %1314 = vmatprep.subr.bf16.mxu0 %v1586_v1  ;;  %1333 = vmatpush3.bf16.msra.mxu1 %v1482_v8 }
  0x18   :  { %1334 = vmatprep.subr.bf16.mxu1 %v1586_v1 }
  0x1a   :  { %1315 = vmatpush3.bf16.msra.mxu0 %v1475_v5 }
  0x1b   :  { %1316 = vmatprep.subr.bf16.mxu0 %v1586_v1  ;;  %1335 = vmatpush3.bf16.msra.mxu1 %v1483_v10 }
  0x1c   :  { %1336 = vmatprep.subr.bf16.mxu1 %v1586_v1 }
  0x1e   :  { %1317 = vmatpush3.bf16.msra.mxu0 %v1476_v7 }
  0x1f   :  { %1318 = vmatprep.subr.bf16.mxu0 %v1586_v1  ;;  %1337 = vmatpush3.bf16.msra.mxu1 %v1484_v12 }
  0x20   :  { %1338 = vmatprep.subr.bf16.mxu1 %v1586_v1 }
  0x22   :  { %1319 = vmatpush3.bf16.msra.mxu0 %v1477_v9 }
  0x23   :  { %1320 = vmatprep.subr.bf16.mxu0 %v1586_v1  ;;  %1339 = vmatpush3.bf16.msra.mxu1 %v1485_v14 }
  0x24   :  { %1340 = vmatprep.subr.bf16.mxu1 %v1586_v1 }
  0x26   :  { %1321 = vmatpush3.bf16.msra.mxu0 %v1478_v11 }
  0x27   :  { %1322 = vmatprep.subr.bf16.mxu0 %v1586_v1 }
  0x2a   :  { %1323 = vmatpush3.bf16.msra.mxu0 %v1479_v13 }
  0x2b   :  { %1348 = vmatprep.subr.bf16.mxu0 %v1586_v1 }
  0x2d   :  { %1325 = vmatmul.mubr.bf16.vlgmr.msra.gmra.mrb[0].mxu0 %v69_v15 }
  0x2e   :  { %1364 = vmatprep.mubr.msk.bf16.mxu0 %vm1587_vm0, %v1586_v1 }
  0x2f   :  { %27 = vsyncpa [#allocation3], 0  ;;  %v1486_v16 = vld [vmem:[%s2102_s30 + $0x30] sm:$0xff]   ;;  %v1487_v17 = vld [vmem:[%s2102_s30 + $0x38] sm:$0xff]   ;;  %s2104_s4 = sld [smem:[#allocation8_spill]]  ;;  %s2105_s23 = sld [smem:[#allocation10_spill]] }
  0x30   :  { %1341 = vmatpush3.bf16.msra.mxu1 %v1486_v16  ;;  %v1488_v18 = vld [vmem:[%s2077_s6] sm:$0xff]   ;;  %v1489_v19 = vld [vmem:[%s2077_s6 + $0x8] sm:$0xff]   ;;  %v1490_v20 = vld [vmem:[%s2077_s6 + $0x10] sm:$0xff]   ;;  %v1588_v11 = vmov 0   ;;  %s2106_s1 = sld [smem:[#allocation6_spill]] }
  0x31   :  { %1342 = vmatprep.subr.bf16.mxu1 %v1586_v1  ;;  %1349 = vmatpush3.bf16.msra.mxu0 %v1488_v18  ;;  %v1491_v21 = vld [vmem:[%s2077_s6 + $0x18] sm:$0xff]   ;;  %v1492_v22 = vld [vmem:[%s2077_s6 + $0x20] sm:$0xff]   ;;  %v1493_v23 = vld [vmem:[%s2077_s6 + $0x28] sm:$0xff]  }
  0x32   :  { %1350 = vmatprep.subr.bf16.mxu0 %v1586_v1  ;;  %v1494_v32 = vld [vmem:[%s2077_s6 + $0x30] sm:$0xff]   ;;  %v1495_v33 = vld [vmem:[%s2077_s6 + $0x38] sm:$0xff]   ;;  %v1496_v34 = vld [vmem:[%s2079_s8] sm:$0xff]  }
  0x33   :  { %v1497_v35 = vld [vmem:[%s2079_s8 + $0x8] sm:$0xff]   ;;  %v1498_v36 = vld [vmem:[%s2079_s8 + $0x10] sm:$0xff]   ;;  %v1499_v37 = vld [vmem:[%s2079_s8 + $0x18] sm:$0xff]  }
  0x34   :  { %1343 = vmatpush3.bf16.msra.mxu1 %v1487_v17  ;;  %v1500_v38 = vld [vmem:[%s2079_s8 + $0x20] sm:$0xff]   ;;  %v1501_v39 = vld [vmem:[%s2079_s8 + $0x28] sm:$0xff]   ;;  %v1502_v48 = vld [vmem:[%s2079_s8 + $0x30] sm:$0xff]  }
  0x35   :  { %1368 = vmatprep.subr.bf16.mxu1 %v1586_v1  ;;  %1351 = vmatpush3.bf16.msra.mxu0 %v1489_v19  ;;  %v1148_v24 = vld [vmem:[%s2104_s4] ss:$0 sm:$0xff]  ;;  %v1503_v49 = vld [vmem:[%s2079_s8 + $0x38] sm:$0xff]   ;;  %v1506_v51 = vld [vmem:[%s2081_s10 + $0x4] ss:$8 sps:$4 sm:$0xff]   ;;  %s1589_s8 = smov [#allocation2]  }
  0x36   :  { %1352 = vmatprep.subr.bf16.mxu0 %v1586_v1  ;;  %v1157_v40 = vld [vmem:[%s2105_s23] ss:$0 sm:$0xff]  ;;  %v1509_v52 = vld [vmem:[%s2081_s10 + $0x14] ss:$8 sps:$4 sm:$0xff]   ;;  %v1507_v53 = vld [vmem:[%s2081_s10 + $0x10] ss:$8 sps:$4 sm:$0xff]  }
  0x37   :  { %v1504_v50 = vld [vmem:[%s2081_s10] ss:$8 sps:$4 sm:$0xff]   ;;  %v1512_v54 = vld [vmem:[%s2081_s10 + $0x24] ss:$8 sps:$4 sm:$0xff]   ;;  %v1515_v56 = vld [vmem:[%s2081_s10 + $0x34] ss:$8 sps:$4 sm:$0xff]  }
  0x38   :  { %v1510_v55 = vld [vmem:[%s2081_s10 + $0x20] ss:$8 sps:$4 sm:$0xff]   ;;  %v1513_v57 = vld [vmem:[%s2081_s10 + $0x30] ss:$8 sps:$4 sm:$0xff]   ;;  %v1518_v58 = vld [vmem:[%s2081_s10 + $0x44] ss:$8 sps:$4 sm:$0xff]  }
  0x39   :  { %1353 = vmatpush3.bf16.msra.mxu0 %v1490_v20  ;;  %v1516_v59 = vld [vmem:[%s2081_s10 + $0x40] ss:$8 sps:$4 sm:$0xff]   ;;  %v1521_v60 = vld [vmem:[%s2081_s10 + $0x54] ss:$8 sps:$4 sm:$0xff]   ;;  %v1519_v61 = vld [vmem:[%s2081_s10 + $0x50] ss:$8 sps:$4 sm:$0xff]  }
  0x3a   :  { %1354 = vmatprep.subr.bf16.mxu0 %v1586_v1  ;;  %v1524_v62 = vld [vmem:[%s2081_s10 + $0x64] ss:$8 sps:$4 sm:$0xff]   ;;  %v1522_v63 = vld [vmem:[%s2081_s10 + $0x60] ss:$8 sps:$4 sm:$0xff]   ;;  %v1527_v9 = vld [vmem:[%s2081_s10 + $0x74] ss:$8 sps:$4 sm:$0xff]  }
  0x3b   :  { %v1166_v0 = vld [vmem:[%s2078_s7] ss:$0 sm:$0xff]  ;;  %v1525_v10 = vld [vmem:[%s2081_s10 + $0x70] ss:$8 sps:$4 sm:$0xff]   ;;  %v1529_v13 = vld [vmem:[%s2083_s12 + $0x8] sm:$0xff]   ;;  %s1136_s4 = sshll.u32 %s1589_s8, 4  ;;  %s1137_s4 = int_to_ptr.vmem [resolvable:$true] %s1136_s4 }
  0x3c   :  { %v1528_v12 = vld [vmem:[%s2083_s12] sm:$0xff]   ;;  %p1567_p1 = scmp.lt.s32.totalorder %s1137_s4, %s1137_s4 }
  0x3d   :  { %1355 = vmatpush3.bf16.msra.mxu0 %v1491_v21  ;;  %v1175_v14 = vld [vmem:[%s2080_s9] ss:$0 sm:$0xff]  ;;  %v1530_v21 = vld [vmem:[%s2083_s12 + $0x10] sm:$0xff]  }
  0x3e   :  { %1356 = vmatprep.subr.bf16.mxu0 %v1586_v1 }
  0x41   :  { %1357 = vmatpush3.bf16.msra.mxu0 %v1492_v22  ;;  %v1531_v22 = vld [vmem:[%s2083_s12 + $0x18] sm:$0xff]  }
  0x42   :  { %1358 = vmatprep.subr.bf16.mxu0 %v1586_v1 }
  0x45   :  { %1359 = vmatpush3.bf16.msra.mxu0 %v1493_v23  ;;  %v1532_v23 = vld [vmem:[%s2083_s12 + $0x20] sm:$0xff]  }
  0x46   :  { %1360 = vmatprep.subr.bf16.mxu0 %v1586_v1 }
  0x49   :  { %1361 = vmatpush3.bf16.msra.mxu0 %v1494_v32  ;;  %v1541_v32 = vld [vmem:[%s2085_s14 + $0x28] sm:$0xff]  }
  0x4a   :  { %1362 = vmatprep.subr.bf16.mxu0 %v1586_v1 }
  0x4d   :  { %1363 = vmatpush3.bf16.msra.mxu0 %v1495_v33  ;;  %v539_v33 = vlaneseq }
  0x4e   :  { %629 = vmatprep.subr.bf16.mxu0 %v1506_v51 }
 0x100   :  { %v175_v25 = vpop.f32.mrb[0].mxu0 }
 0x101   :  { %v176_v26 = vadd.f32 %v1148_v24, %v175_v25  ;;  %v1326_v27 = vpop.f32.mrb[1].mxu0  ;;  %v1533_v24 = vld [vmem:[%s2083_s12 + $0x28] sm:$0xff]   ;;  %v1534_v25 = vld [vmem:[%s2083_s12 + $0x30] sm:$0xff]  }
 0x102   :  { %v178_v28 = vpop.f32.mrb[2].mxu0  ;;  %v1536_v27 = vld [vmem:[%s2085_s14] sm:$0xff]  }
 0x103   :  { %v181_v29 = vmax.f32 %v176_v26, 0.0  ;;  %v1327_v30 = vpop.f32.mrb[3].mxu0  ;;  %v1535_v26 = vld [vmem:[%s2083_s12 + $0x38] sm:$0xff]   ;;  %v1537_v28 = vld [vmem:[%s2085_s14 + $0x8] sm:$0xff]  }
 0x104   :  { %v1539_v30 = vld [vmem:[%s2085_s14 + $0x18] sm:$0xff]  }
 0x105   :  { %v182_v31 = vpack.c.bf16 %v181_v29, %v181_v29  ;;  %v1538_v29 = vld [vmem:[%s2085_s14 + $0x10] sm:$0xff]  }
 0x107   :  { %1345 = vmatmul.mubr.bf16.vlgmr.msra.gmra.mrb[0].mxu1 %v182_v31  ;;  %v1540_v31 = vld [vmem:[%s2085_s14 + $0x20] sm:$0xff]  }
 0x108   :  { %1384 = vmatprep.mubr.msk.bf16.mxu1 %vm1587_vm0, %v1586_v1  ;;  %1369 = vmatpush3.bf16.msra.mxu1 %v1496_v34  ;;  %v540_v34 = vshrl.u32 %v539_v33, 7 }
 0x109   :  { %1370 = vmatprep.subr.bf16.mxu1 %v1586_v1 }
 0x10c   :  { %1371 = vmatpush3.bf16.msra.mxu1 %v1497_v35  ;;  %v541_v35 = vsub.s32 0, %v540_v34 }
 0x10d   :  { %1372 = vmatprep.subr.bf16.mxu1 %v1586_v1 }
 0x110   :  { %1373 = vmatpush3.bf16.msra.mxu1 %v1498_v36  ;;  %v537_v36 = vld [vmem:[%s2082_s11] sm:$0x3] }
 0x111   :  { %1374 = vmatprep.subr.bf16.mxu1 %v1586_v1 }
 0x114   :  { %1375 = vmatpush3.bf16.msra.mxu1 %v1499_v37  ;;  %v545_v37 = vsub.s32 1, %v540_v34 }
 0x115   :  { %1376 = vmatprep.subr.bf16.mxu1 %v1586_v1 }
 0x118   :  { %1377 = vmatpush3.bf16.msra.mxu1 %v1500_v38  ;;  %v542_v38 = vrot.slane %v537_v36, %v541_v35 }
 0x119   :  { %1378 = vmatprep.subr.bf16.mxu1 %v1586_v1 }
 0x11c   :  { %1379 = vmatpush3.bf16.msra.mxu1 %v1501_v39  ;;  %v546_v39 = vrot.slane %v537_v36, %v545_v37 }
 0x11d   :  { %1380 = vmatprep.subr.bf16.mxu1 %v1586_v1 }
 0x120   :  { %1381 = vmatpush3.bf16.msra.mxu1 %v1502_v48  ;;  %v670_v48 = vld [vmem:[%s2106_s1] sm:$0xff] }
 0x121   :  { %1382 = vmatprep.subr.bf16.mxu1 %v1586_v1 }
 0x124   :  { %1383 = vmatpush3.bf16.msra.mxu1 %v1503_v49 }
 0x125   :  { %1388 = vmatprep.subr.bf16.mxu1 %v1586_v1 }
 0x1da   :  { %v288_v41 = vpop.f32.mrb[0].mxu1 }
 0x1db   :  { %v289_v42 = vadd.f32 %v1157_v40, %v288_v41  ;;  %v1346_v43 = vpop.f32.mrb[1].mxu1 }
 0x1dc   :  { %v291_v44 = vpop.f32.mrb[2].mxu1 }
 0x1dd   :  { %v294_v45 = vmax.f32 %v289_v42, 0.0  ;;  %v1347_v46 = vpop.f32.mrb[3].mxu1 }
 0x1df   :  { %v295_v47 = vpack.c.bf16 %v294_v45, %v294_v45 }
 0x1e1   :  { %1365 = vmatmul.mubr.bf16.vlgmr.msra.gmra.mrb[4].mxu0 %v295_v47 }
 0x1e2   :  { %630 = vmatpush1.bf16.msra.mxu0 %v1504_v50  ;;  %661 = vmatprep.mubr.bf16.mxu0 %v1588_v11  ;;  %v1555_v11 = vld [vmem:[%s2089_s18 + $0x18] sm:$0xff]  }
 0x1e3   :  { %631 = vmatprep.subr.bf16.mxu0 %v1509_v52 }
 0x1e6   :  { %632 = vmatpush1.bf16.msra.mxu0 %v1507_v53  ;;  %v1542_v53 = vld [vmem:[%s2085_s14 + $0x30] sm:$0xff]  }
 0x1e7   :  { %633 = vmatprep.subr.bf16.mxu0 %v1512_v54  ;;  %v1543_v54 = vld [vmem:[%s2085_s14 + $0x38] sm:$0xff]  }
 0x1ea   :  { %634 = vmatpush1.bf16.msra.mxu0 %v1510_v55  ;;  %v1544_v55 = vld [vmem:[%s2087_s16] sm:$0xff]  }
 0x1eb   :  { %635 = vmatprep.subr.bf16.mxu0 %v1515_v56  ;;  %v1545_v56 = vld [vmem:[%s2087_s16 + $0x8] sm:$0xff]  }
 0x1ee   :  { %636 = vmatpush1.bf16.msra.mxu0 %v1513_v57  ;;  %v1546_v57 = vld [vmem:[%s2087_s16 + $0x10] sm:$0xff]  }
 0x1ef   :  { %637 = vmatprep.subr.bf16.mxu0 %v1518_v58  ;;  %v1547_v58 = vld [vmem:[%s2087_s16 + $0x18] sm:$0xff]  }
 0x1f2   :  { %638 = vmatpush1.bf16.msra.mxu0 %v1516_v59  ;;  %v1548_v59 = vld [vmem:[%s2087_s16 + $0x20] sm:$0xff]  }
 0x1f3   :  { %639 = vmatprep.subr.bf16.mxu0 %v1521_v60  ;;  %v1549_v60 = vld [vmem:[%s2087_s16 + $0x28] sm:$0xff]  }
 0x1f6   :  { %640 = vmatpush1.bf16.msra.mxu0 %v1519_v61  ;;  %v1200_v61 = vld [vmem:[%s2084_s13] ss:$0 sm:$0xff] }
 0x1f7   :  { %641 = vmatprep.subr.bf16.mxu0 %v1524_v62 }
 0x1fa   :  { %642 = vmatpush1.bf16.msra.mxu0 %v1522_v63 }
 0x1fb   :  { %643 = vmatprep.subr.bf16.mxu0 %v1527_v9  ;;  %v1553_v9 = vld [vmem:[%s2089_s18 + $0x8] sm:$0xff]  }
 0x1fe   :  { %644 = vmatpush1.bf16.msra.mxu0 %v1525_v10  ;;  %v1554_v10 = vld [vmem:[%s2089_s18 + $0x10] sm:$0xff]  }
 0x1ff   :  { %1408 = vmatprep.subr.bf16.mxu0 %v1586_v1 }
 0x2b4   :  { %v401_v2 = vpop.f32.mrb[4].mxu0 }
 0x2b5   :  { %v402_v3 = vadd.f32 %v1166_v0, %v401_v2  ;;  %v1366_v4 = vpop.f32.mrb[5].mxu0 }
 0x2b6   :  { %v404_v5 = vpop.f32.mrb[6].mxu0 }
 0x2b7   :  { %v407_v6 = vmax.f32 %v402_v3, 0.0  ;;  %v1367_v7 = vpop.f32.mrb[7].mxu0 }
 0x2b8   :  { %v1551_v7 = vld [vmem:[%s2087_s16 + $0x38] sm:$0xff]  }
 0x2b9   :  { %v408_v8 = vpack.c.bf16 %v407_v6, %v407_v6  ;;  %v1550_v6 = vld [vmem:[%s2087_s16 + $0x30] sm:$0xff]  }
 0x2bb   :  { %1385 = vmatmul.mubr.bf16.vlgmr.msra.gmra.mrb[4].mxu1 %v408_v8  ;;  %v1552_v8 = vld [vmem:[%s2089_s18] sm:$0xff]  }
 0x2bc   :  { %1404 = vmatprep.mubr.msk.bf16.mxu1 %vm1587_vm0, %v1586_v1  ;;  %1389 = vmatpush3.bf16.msra.mxu1 %v1528_v12  ;;  %v1556_v12 = vld [vmem:[%s2089_s18 + $0x20] sm:$0xff]  }
 0x2bd   :  { %1390 = vmatprep.subr.bf16.mxu1 %v1586_v1 }
 0x2c0   :  { %1391 = vmatpush3.bf16.msra.mxu1 %v1529_v13  ;;  %v1557_v13 = vld [vmem:[%s2089_s18 + $0x28] sm:$0xff]  }
 0x2c1   :  { %1392 = vmatprep.subr.bf16.mxu1 %v1586_v1 }
 0x2c4   :  { %1393 = vmatpush3.bf16.msra.mxu1 %v1530_v21 }
 0x2c5   :  { %1394 = vmatprep.subr.bf16.mxu1 %v1586_v1 }
 0x2c8   :  { %1395 = vmatpush3.bf16.msra.mxu1 %v1531_v22  ;;  %v1558_v22 = vld [vmem:[%s2089_s18 + $0x30] sm:$0xff]  }
 0x2c9   :  { %1396 = vmatprep.subr.bf16.mxu1 %v1586_v1 }
 0x2cc   :  { %1397 = vmatpush3.bf16.msra.mxu1 %v1532_v23  ;;  %v1559_v23 = vld [vmem:[%s2089_s18 + $0x38] sm:$0xff]  }
 0x2cd   :  { %1398 = vmatprep.subr.bf16.mxu1 %v1586_v1 }
 0x2d0   :  { %1399 = vmatpush3.bf16.msra.mxu1 %v1533_v24  ;;  %v1218_v24 = vld [vmem:[%s2088_s17] ss:$0 sm:$0xff]  ;;  %s1562_s17 = scalar_lea.vmem %s1137_s4, 128 }
 0x2d1   :  { %1400 = vmatprep.subr.bf16.mxu1 %v1586_v1  ;;  %p1563_p0 = scmp.ne.s32.totalorder %s1137_s4, %s1562_s17  ;;  %p1568_p2 = scmp.lt.s32.totalorder %s1562_s17, %s1562_s17 }
 0x2d3   :  { %p1569_p3 = por %p1568_p2, %p1567_p1 }
 0x2d4   :  { %1401 = vmatpush3.bf16.msra.mxu1 %v1534_v25 }
 0x2d5   :  { %1402 = vmatprep.subr.bf16.mxu1 %v1586_v1  ;;  %p1570_p4 = pnand %p1569_p3, %p1563_p0 }
 0x2d8   :  { %1403 = vmatpush3.bf16.msra.mxu1 %v1535_v26 }
 0x2d9   :  { %1428 = vmatprep.subr.bf16.mxu1 %v1586_v1 }
 0x38e   :  { %v514_v15 = vpop.f32.mrb[4].mxu1 }
 0x38f   :  { %v515_v16 = vadd.f32 %v1175_v14, %v514_v15  ;;  %v1386_v17 = vpop.f32.mrb[5].mxu1  ;;  %v1209_v14 = vld [vmem:[%s2086_s15] ss:$0 sm:$0xff] }
 0x390   :  { %v517_v18 = vpop.f32.mrb[6].mxu1 }
 0x391   :  { %v520_v19 = vpack.c.bf16 %v515_v16, %v515_v16  ;;  %v1387_v20 = vpop.f32.mrb[7].mxu1 }
 0x393   :  { %662 = vmatmul.mubr.bf16.vlgmr.msra.gmra.mrb[8].mxu0 %v520_v19 }
 0x394   :  { %1424 = vmatprep.mubr.msk.bf16.mxu0 %vm1587_vm0, %v1586_v1  ;;  %1409 = vmatpush3.bf16.msra.mxu0 %v1536_v27 }
 0x395   :  { %1410 = vmatprep.subr.bf16.mxu0 %v1586_v1 }
 0x398   :  { %1411 = vmatpush3.bf16.msra.mxu0 %v1537_v28 }
 0x399   :  { %1412 = vmatprep.subr.bf16.mxu0 %v1586_v1 }
 0x39c   :  { %1413 = vmatpush3.bf16.msra.mxu0 %v1538_v29 }
 0x39d   :  { %1414 = vmatprep.subr.bf16.mxu0 %v1586_v1 }
 0x3a0   :  { %1415 = vmatpush3.bf16.msra.mxu0 %v1539_v30 }
 0x3a1   :  { %1416 = vmatprep.subr.bf16.mxu0 %v1586_v1 }
 0x3a4   :  { %1417 = vmatpush3.bf16.msra.mxu0 %v1540_v31 }
 0x3a5   :  { %1418 = vmatprep.subr.bf16.mxu0 %v1586_v1 }
 0x3a8   :  { %1419 = vmatpush3.bf16.msra.mxu0 %v1541_v32 }
 0x3a9   :  { %1420 = vmatprep.subr.bf16.mxu0 %v1586_v1 }
 0x3ac   :  { %1421 = vmatpush3.bf16.msra.mxu0 %v1542_v53 }
 0x3ad   :  { %1422 = vmatprep.subr.bf16.mxu0 %v1586_v1 }
 0x3b0   :  { %1423 = vmatpush3.bf16.msra.mxu0 %v1543_v54 }
 0x3b1   :  { %1448 = vmatprep.subr.bf16.mxu0 %v1586_v1 }
 0x466   :  { %v663_v40 = vpop.f32.mrb[8].mxu0 }
 0x467   :  { %v664_v41 = vadd.f32 %v663_v40, %v542_v38  ;;  %v665_v42 = vpop.f32.mrb[9].mxu0 }
 0x468   :  { %v666_v43 = vadd.f32 %v665_v42, %v546_v39  ;;  %v667_v44 = vpop.f32.mrb[10].mxu0 }
 0x469   :  { %1128 = vst [vmem:[%s2092_s21] sm:$0xff] %v664_v41  ;;  %v668_v45 = vpop.f32.mrb[11].mxu0 }
 0x46a   :  { %v671_v46 = vmul.f32 0.5, %v666_v43  ;;  %1129 = vst [vmem:[%s2092_s21 + $0x8] sm:$0xff] %v666_v43 }
 0x46c   :  { %v672_v47 = vmul.f32 1.442695, %v671_v46 }
 0x46e   :  { %1560 = vpow2.f32 %v672_v47 }
 0x478   :  { %v1561_v49 = vpop.eup %1560 }
 0x479   :  { %v674_v50 = vmul.f32 %v1561_v49, %v670_v48 }
 0x47b   :  { %v675_v51 = vadd.f32 %v674_v50, %v664_v41 }
 0x47d   :  { %v676_v52 = vpack.c.bf16 %v675_v51, %v675_v51 }
 0x47f   :  { %1405 = vmatmul.mubr.bf16.vlgmr.msra.gmra.mrb[8].mxu1 %v676_v52 }
 0x480   :  { %1444 = vmatprep.mubr.msk.bf16.mxu1 %vm1587_vm0, %v1586_v1  ;;  %1429 = vmatpush3.bf16.msra.mxu1 %v1544_v55 }
 0x481   :  { %1430 = vmatprep.subr.bf16.mxu1 %v1586_v1 }
 0x484   :  { %1431 = vmatpush3.bf16.msra.mxu1 %v1545_v56 }
 0x485   :  { %1432 = vmatprep.subr.bf16.mxu1 %v1586_v1 }
 0x488   :  { %1433 = vmatpush3.bf16.msra.mxu1 %v1546_v57 }
 0x489   :  { %1434 = vmatprep.subr.bf16.mxu1 %v1586_v1 }
 0x48c   :  { %1435 = vmatpush3.bf16.msra.mxu1 %v1547_v58 }
 0x48d   :  { %1436 = vmatprep.subr.bf16.mxu1 %v1586_v1 }
 0x490   :  { %1437 = vmatpush3.bf16.msra.mxu1 %v1548_v59 }
 0x491   :  { %1438 = vmatprep.subr.bf16.mxu1 %v1586_v1 }
 0x494   :  { %1439 = vmatpush3.bf16.msra.mxu1 %v1549_v60 }
 0x495   :  { %1440 = vmatprep.subr.bf16.mxu1 %v1586_v1 }
 0x498   :  { %1441 = vmatpush3.bf16.msra.mxu1 %v1550_v6 }
 0x499   :  { %1442 = vmatprep.subr.bf16.mxu1 %v1586_v1 }
 0x49c   :  { %1443 = vmatpush3.bf16.msra.mxu1 %v1551_v7 }
 0x552   :  { %v782_v62 = vpop.f32.mrb[8].mxu1 }
 0x553   :  { %v783_v63 = vadd.f32 %v1200_v61, %v782_v62  ;;  %v1406_v0 = vpop.f32.mrb[9].mxu1 }
 0x554   :  { %v785_v2 = vpop.f32.mrb[10].mxu1 }
 0x555   :  { %v788_v3 = vmax.f32 %v783_v63, 0.0  ;;  %v1407_v4 = vpop.f32.mrb[11].mxu1 }
 0x557   :  { %v789_v5 = vpack.c.bf16 %v788_v3, %v788_v3 }
 0x559   :  { %1425 = vmatmul.mubr.bf16.vlgmr.msra.gmra.mrb[12].mxu0 %v789_v5 }
 0x55a   :  { %1464 = vmatprep.mubr.msk.bf16.mxu0 %vm1587_vm0, %v1586_v1  ;;  %1449 = vmatpush3.bf16.msra.mxu0 %v1552_v8 }
 0x55b   :  { %1450 = vmatprep.subr.bf16.mxu0 %v1586_v1 }
 0x55e   :  { %1451 = vmatpush3.bf16.msra.mxu0 %v1553_v9 }
 0x55f   :  { %1452 = vmatprep.subr.bf16.mxu0 %v1586_v1 }
 0x562   :  { %1453 = vmatpush3.bf16.msra.mxu0 %v1554_v10 }
 0x563   :  { %1454 = vmatprep.subr.bf16.mxu0 %v1586_v1 }
 0x566   :  { %1455 = vmatpush3.bf16.msra.mxu0 %v1555_v11 }
 0x567   :  { %1456 = vmatprep.subr.bf16.mxu0 %v1586_v1 }
 0x56a   :  { %1457 = vmatpush3.bf16.msra.mxu0 %v1556_v12 }
 0x56b   :  { %1458 = vmatprep.subr.bf16.mxu0 %v1586_v1 }
 0x56e   :  { %1459 = vmatpush3.bf16.msra.mxu0 %v1557_v13 }
 0x56f   :  { %1460 = vmatprep.subr.bf16.mxu0 %v1586_v1 }
 0x572   :  { %1461 = vmatpush3.bf16.msra.mxu0 %v1558_v22 }
 0x573   :  { %1462 = vmatprep.subr.bf16.mxu0 %v1586_v1  ;;  %v1227_v1 = vld [vmem:[%s2090_s19] ss:$0 sm:$0xff] }
 0x576   :  { %1463 = vmatpush3.bf16.msra.mxu0 %v1559_v23 }
 0x62c   :  { %v895_v15 = vpop.f32.mrb[12].mxu0 }
 0x62d   :  { %v896_v16 = vadd.f32 %v1209_v14, %v895_v15  ;;  %v1426_v17 = vpop.f32.mrb[13].mxu0 }
 0x62e   :  { %v898_v18 = vpop.f32.mrb[14].mxu0 }
 0x62f   :  { %v901_v19 = vmax.f32 %v896_v16, 0.0  ;;  %v1427_v20 = vpop.f32.mrb[15].mxu0 }
 0x631   :  { %v902_v21 = vpack.c.bf16 %v901_v19, %v901_v19 }
 0x633   :  { %1445 = vmatmul.mubr.bf16.vlgmr.msra.gmra.mrb[12].mxu1 %v902_v21 }
 0x706   :  { %v1008_v25 = vpop.f32.mrb[12].mxu1 }
 0x707   :  { %v1009_v26 = vadd.f32 %v1218_v24, %v1008_v25  ;;  %v1446_v27 = vpop.f32.mrb[13].mxu1 }
 0x708   :  { %v1011_v28 = vpop.f32.mrb[14].mxu1 }
 0x709   :  { %v1014_v29 = vmax.f32 %v1009_v26, 0.0  ;;  %v1447_v30 = vpop.f32.mrb[15].mxu1 }
 0x70b   :  { %v1015_v31 = vpack.c.bf16 %v1014_v29, %v1014_v29 }
 0x70d   :  { %1465 = vmatmul.mubr.bf16.vlgmr.msra.gmra.mrb[16].mxu0 %v1015_v31 }
 0x7e0   :  { %v1121_v32 = vpop.f32.mrb[16].mxu0 }
 0x7e1   :  { %v1122_v33 = vadd.f32 %v1227_v1, %v1121_v32  ;;  %v1466_v34 = vpop.f32.mrb[17].mxu0 }
 0x7e2   :  { %v1124_v35 = vpop.f32.mrb[18].mxu0 }
 0x7e3   :  { %1127 = vst [vmem:[#allocation2] sm:$0xff] %v1122_v33  ;;  %v1467_v36 = vpop.f32.mrb[19].mxu0 }
 0x7e4   :  { %1573 = shalt.err (!%p1570_p4)
}
 0x7e5   :  { %s1574_s19 = scalar_lea.hbm %s2091_s20, 128 }
 0x7e6   :  { %p1575_p5 = scmp.ne.s32.totalorder %s2091_s20, %s1574_s19  ;;  %p1578_p6 = scmp.lt.u32.totalorder %s1574_s19, %s2091_s20 }
 0x7e8   :  { %p1580_p7 = pnand %p1578_p6, %p1575_p5 }
 0x7ea   :  { %1583 = shalt.err (!%p1580_p7)
}
 0x7eb   :  { %1139 = dma.vmem_to_hbm [thread:$0]  %s1137_s4, 128, %s2091_s20, [#allocation3]  }
 0x7ec   :  { %1584 = dma.done.wait [#allocation3], 128  }
 0x7ed   :  { %1585 = vsyncadd [#allocation3], 4294967168 }
 0x7ee   :  { %1147 = vsyncpa [#allocation3], 1 }

</bundles_post_ra>
